<compile_context>
chip_gen: v7x
topology: tpu7x:2x2x1
jax: 0.10.0
libtpu: 0.0.40
codegen_flags: <defaults>
</compile_context>

<pallas_src>
import jax
import jax.numpy as jnp
from jax.experimental import pallas as pl
from jax.experimental.pallas import tpu as pltpu

IN_FEATURES = 28 * 28  # 784
OUT_FEATURES = 1

# Big enough to amortize the ~0.35 us per-grid-step cost and keep the DMA
# pipeline busy; small enough that the double-buffered f32 x-tile
# (2 * 1024 * 784 * 4 B ~= 6.4 MiB) fits v5e's 16 MiB default scoped VMEM
# (and trivially v6e/v7x's 32 MiB scoped default).
DEFAULT_BATCH_TILE = 1024


def linear_kernel(x_ref, w_ref, b_ref, o_ref):
    # x_ref: (TB, 784) VMEM   w_ref: (784, 1) VMEM   b_ref: (1,) SMEM
    # o_ref: (TB, 1)  VMEM
    acc = jnp.dot(x_ref[...], w_ref[...], preferred_element_type=jnp.float32)
    bias = b_ref[0].astype(jnp.float32)  # scalar add on the VPU, f32 accum
    o_ref[...] = (acc + bias).astype(o_ref.dtype)


def simple_linear_forward(x, w, b, *, batch_tile=DEFAULT_BATCH_TILE):
    """Equivalent of SimpleLinearModel.forward: x.view(-1, 784) @ w + b.

    x: any shape that flattens to (-1, 784), e.g. (B, 1, 28, 28)
    w: (784, 1)   (transposed relative to PyTorch's (out, in) weight layout)
    b: (1,)
    """
    x2d = x.reshape(-1, IN_FEATURES)  # x.view(-1, 28*28)
    B = x2d.shape[0]

    # Small batches: one full-size block (grid step overhead would dominate).
    # Large batches: tile the batch axis so the x DMA is software-pipelined.
    tb = B if B <= batch_tile else batch_tile  # batch_tile is a multiple of 8
    num_tiles = pl.cdiv(B, tb)

    out = pl.pallas_call(
        linear_kernel,
        out_shape=jax.ShapeDtypeStruct((B, OUT_FEATURES), x2d.dtype),
        grid_spec=pltpu.PrefetchScalarGridSpec(
            num_scalar_prefetch=0,
            grid=(num_tiles,),
            in_specs=[
                # x: tiled over batch -> double-buffered by the Pallas pipeline.
                pl.BlockSpec((tb, IN_FEATURES), lambda i: (i, 0)),
                # weight: same block every step (stays resident in VMEM).
                pl.BlockSpec((IN_FEATURES, OUT_FEATURES), lambda i: (0, 0)),
                # bias: single scalar passed through SMEM (no padded VMEM tile).
                pl.BlockSpec(memory_space=pltpu.MemorySpace.SMEM),
            ],
            out_specs=pl.BlockSpec((tb, OUT_FEATURES), lambda i: (i, 0)),
        ),
        compiler_params=pltpu.CompilerParams(
            # Independent batch tiles -> shard across v7x's 2 TensorCores
            # (harmless on single-TC v5e/v6e).
            dimension_semantics=("parallel",),
        ),
    )(x2d, w, b)
    return out


if __name__ == "__main__":
    key = jax.random.PRNGKey(0)
    kx, kw, kb, kx2 = jax.random.split(key, 4)

    # Deterministic parameter init mimicking nn.Linear default:
    # uniform(-1/sqrt(in_features), 1/sqrt(in_features)).
    bound = 1.0 / (IN_FEATURES ** 0.5)
    # PyTorch stores weight as (out, in); we keep the transposed (in, out) layout.
    w = jax.random.uniform(kw, (IN_FEATURES, OUT_FEATURES), jnp.float32,
                           minval=-bound, maxval=bound)
    b = jax.random.uniform(kb, (OUT_FEATURES,), jnp.float32,
                           minval=-bound, maxval=bound)

    # Small batch of MNIST-shaped inputs (NCHW): single-block path.
    x = jax.random.normal(kx, (8, 1, 28, 28), jnp.float32)
    out = jax.block_until_ready(simple_linear_forward(x, w, b))
    ref = x.reshape(-1, IN_FEATURES) @ w + b.reshape(1, -1)
    assert out.shape == (8, 1)
    assert jnp.allclose(out, ref, atol=1e-5, rtol=1e-5)

    # Larger batch (not a multiple of the tile) exercises the tiled,
    # pipelined path with a ragged final block.
    B2 = 2 * DEFAULT_BATCH_TILE + 16
    x_big = jax.random.normal(kx2, (B2, 1, 28, 28), jnp.float32)
    out_big = jax.block_until_ready(simple_linear_forward(x_big, w, b))
    ref_big = x_big.reshape(-1, IN_FEATURES) @ w + b.reshape(1, -1)
    assert out_big.shape == (B2, 1)
    assert jnp.allclose(out_big, ref_big, atol=1e-5, rtol=1e-5)

    print("KERNEL_OK")
</pallas_src>

<mosaic_0001>
module attributes {stable_mosaic.version = 11 : i64} {
  func.func @linear_kernel(%arg0: i32, %arg1: memref<8x784xf32, #tpu.memory_space<vmem>>, %arg2: memref<784x1xf32, #tpu.memory_space<vmem>>, %arg3: memref<1xf32, #tpu.memory_space<smem>>, %arg4: memref<8x1xf32, #tpu.memory_space<vmem>>) attributes {dimension_semantics = [#tpu.dimension_semantics<parallel>], iteration_bounds = array<i64: 1>, scalar_prefetch = 0 : i64, scratch_operands = 0 : i64, tpu.core_type = #tpu.core_type<tc>, window_params = [{transform_indices = @transform_0, window_bounds = array<i64: 8, 784>}, {pipeline_mode = #tpu.pipeline_mode<synchronous>, transform_indices = @transform_1, window_bounds = array<i64: 784, 1>}, {transform_indices = @transform_2, window_bounds = array<i64: 1>}, {transform_indices = @transform_3, window_bounds = array<i64: 8, 1>}]} {
    %c0 = arith.constant 0 : index
    %c0_0 = arith.constant 0 : index
    %0 = vector.load %arg1[%c0, %c0_0] : memref<8x784xf32, #tpu.memory_space<vmem>>, vector<8x784xf32>
    %c0_1 = arith.constant 0 : index
    %c0_2 = arith.constant 0 : index
    %1 = vector.load %arg2[%c0_1, %c0_2] : memref<784x1xf32, #tpu.memory_space<vmem>>, vector<784x1xf32>
    %cst = arith.constant dense<0.000000e+00> : vector<8x1xf32>
    %2 = tpu.matmul %0, %1, %cst {dimension_numbers = #tpu.dot_dimension_numbers<[1], [0], [0], [1], [0, 0, 1, 1], [], []>} : vector<8x784xf32>, vector<784x1xf32>, vector<8x1xf32> -> vector<8x1xf32>
    %c0_3 = arith.constant 0 : index
    %3 = memref.load %arg3[%c0_3] : memref<1xf32, #tpu.memory_space<smem>>
    %4 = vector.broadcast %3 : f32 to vector<8x1xf32>
    %5 = arith.addf %2, %4 : vector<8x1xf32>
    %c0_4 = arith.constant 0 : index
    %c0_5 = arith.constant 0 : index
    %6 = vector.load %arg4[%c0_4, %c0_5] : memref<8x1xf32, #tpu.memory_space<vmem>>, vector<8x1xf32>
    tpu.vector_store %arg4[%c0_4, %c0_5], %5 {strides = array<i32>} : memref<8x1xf32, #tpu.memory_space<vmem>>, vector<8x1xf32>,
    return
  }
  func.func @transform_0(%arg0: i32) -> (i32, i32) {
    %c0_i32 = arith.constant 0 : i32
    %c0_i32_0 = arith.constant 0 : i32
    return %arg0, %c0_i32 : i32, i32
  }
  func.func @transform_1(%arg0: i32) -> (i32, i32) {
    %c0_i32 = arith.constant 0 : i32
    %c0_i32_0 = arith.constant 0 : i32
    %c0_i32_1 = arith.constant 0 : i32
    return %c0_i32, %c0_i32_0 : i32, i32
  }
  func.func @transform_2(%arg0: i32) -> i32 {
    %c0_i32 = arith.constant 0 : i32
    %c0_i32_0 = arith.constant 0 : i32
    return %c0_i32 : i32
  }
  func.func @transform_3(%arg0: i32) -> (i32, i32) {
    %c0_i32 = arith.constant 0 : i32
    %c0_i32_0 = arith.constant 0 : i32
    return %arg0, %c0_i32 : i32, i32
  }
}

</mosaic_0001>

<bundles_post_ra>
// kernel: tpu_custom_call.1
= control target key start
LH: loop header
LB: loop body
LE: loop exit
PB: predicated region body
PF: predicated region fallthrough
CT: control target
= control target key end

     0   :  { %vm631_vm0 = vmmov 0   ;;  %vm122_vm1 = vcmask 130048   ;;  %vm406_vm2 = vcmask 7168   ;;  %s974_s1 = inlined_call_operand.vmem [shape: f32[784,1], index: 1, kind: input, shape index: {}]   ;;  %s975_s0 = inlined_call_operand.vmem [shape: f32[8,784], index: 0, kind: input, shape index: {}]   ;;  %s976_s2 = inlined_call_operand.<no memory space> [shape: f32[1], index: 2, kind: input, shape index: {}]   ;;  %s977_s3 = inlined_call_operand.vmem [shape: f32[8,1], index: 3, kind: output, shape index: {}]  }
   0x1   :  { %v38_v0 = vld [vmem:[%s974_s1 + $0x80] sm:$0xff]  ;;  %v39_v1 = vld [vmem:[%s974_s1 + $0x88] sm:$0xff]  ;;  %v40_v11 = vld [vmem:[%s974_s1 + $0x90] sm:$0xff] }
   0x2   :  { %v22_v2 = vld [vmem:[%s974_s1] sm:$0xff]  ;;  %v528_v3 = vpack.c.bf16 %v39_v1, %v38_v0  ;;  %v23_v4 = vld [vmem:[%s974_s1 + $0x8] sm:$0xff]  ;;  %v41_v13 = vld [vmem:[%s974_s1 + $0x98] sm:$0xff] }
   0x3   :  { %v70_v5 = vld [vmem:[%s974_s1 + $0x180] sm:$0xff]  ;;  %v71_v6 = vld [vmem:[%s974_s1 + $0x188] sm:$0xff]  ;;  %v530_v7 = vpack.c.bf16 %v23_v4, %v22_v2  ;;  %v24_v14 = vld [vmem:[%s974_s1 + $0x10] sm:$0xff]  ;;  %v532_v16 = vpack.c.bf16 %v41_v13, %v40_v11 }
   0x4   :  { %v560_v8 = vpack.c.bf16 %v71_v6, %v70_v5  ;;  %v54_v9 = vld [vmem:[%s974_s1 + $0x100] sm:$0xff]  ;;  %v55_v10 = vld [vmem:[%s974_s1 + $0x108] sm:$0xff]  ;;  %529 = vmatprep.subr.bf16.mxu0 %v528_v3  ;;  %v25_v15 = vld [vmem:[%s974_s1 + $0x18] sm:$0xff] }
   0x5   :  { %v562_v12 = vpack.c.bf16 %v55_v10, %v54_v9  ;;  %531 = vmatpush3.bf16.msra.mxu0 %v530_v7  ;;  %v534_v17 = vpack.c.bf16 %v25_v15, %v24_v14  ;;  %v72_v18 = vld [vmem:[%s974_s1 + $0x190] sm:$0xff]  ;;  %v73_v19 = vld [vmem:[%s974_s1 + $0x198] sm:$0xff]  ;;  %v42_v23 = vld [vmem:[%s974_s1 + $0xa0] sm:$0xff] }
   0x6   :  { %561 = vmatprep.subr.bf16.mxu1 %v560_v8  ;;  %v56_v20 = vld [vmem:[%s974_s1 + $0x110] sm:$0xff]  ;;  %v564_v21 = vpack.c.bf16 %v73_v19, %v72_v18  ;;  %v57_v22 = vld [vmem:[%s974_s1 + $0x118] sm:$0xff]  ;;  %v43_v24 = vld [vmem:[%s974_s1 + $0xa8] sm:$0xff]  ;;  %533 = vmatprep.subr.bf16.mxu0 %v532_v16 }
   0x7   :  { %563 = vmatpush3.bf16.msra.mxu1 %v562_v12  ;;  %v566_v25 = vpack.c.bf16 %v57_v22, %v56_v20  ;;  %v536_v26 = vpack.c.bf16 %v43_v24, %v42_v23  ;;  %v26_v27 = vld [vmem:[%s974_s1 + $0x20] sm:$0xff]  ;;  %v27_v28 = vld [vmem:[%s974_s1 + $0x28] sm:$0xff]  ;;  %v44_v35 = vld [vmem:[%s974_s1 + $0xb0] sm:$0xff] }
   0x8   :  { %v74_v29 = vld [vmem:[%s974_s1 + $0x1a0] sm:$0xff]  ;;  %565 = vmatprep.subr.bf16.mxu1 %v564_v21  ;;  %v75_v30 = vld [vmem:[%s974_s1 + $0x1a8] sm:$0xff]  ;;  %v538_v33 = vpack.c.bf16 %v27_v28, %v26_v27  ;;  %v45_v36 = vld [vmem:[%s974_s1 + $0xb8] sm:$0xff] }
   0x9   :  { %v58_v31 = vld [vmem:[%s974_s1 + $0x120] sm:$0xff]  ;;  %v59_v32 = vld [vmem:[%s974_s1 + $0x128] sm:$0xff]  ;;  %535 = vmatpush3.bf16.msra.mxu0 %v534_v17  ;;  %v568_v34 = vpack.c.bf16 %v75_v30, %v74_v29  ;;  %v28_v37 = vld [vmem:[%s974_s1 + $0x30] sm:$0xff]  ;;  %v540_v39 = vpack.c.bf16 %v45_v36, %v44_v35 }
   0xa   :  { %537 = vmatprep.subr.bf16.mxu0 %v536_v26  ;;  %v570_v38 = vpack.c.bf16 %v59_v32, %v58_v31  ;;  %v29_v40 = vld [vmem:[%s974_s1 + $0x38] sm:$0xff]  ;;  %v76_v41 = vld [vmem:[%s974_s1 + $0x1b0] sm:$0xff]  ;;  %v46_v46 = vld [vmem:[%s974_s1 + $0xc0] sm:$0xff] }
   0xb   :  { %567 = vmatpush3.bf16.msra.mxu1 %v566_v25  ;;  %v77_v42 = vld [vmem:[%s974_s1 + $0x1b8] sm:$0xff]  ;;  %v60_v44 = vld [vmem:[%s974_s1 + $0x130] sm:$0xff]  ;;  %v47_v47 = vld [vmem:[%s974_s1 + $0xc8] sm:$0xff]  ;;  %v542_v48 = vpack.c.bf16 %v29_v40, %v28_v37 }
   0xc   :  { %569 = vmatprep.subr.bf16.mxu1 %v568_v34  ;;  %v572_v43 = vpack.c.bf16 %v77_v42, %v76_v41  ;;  %v61_v45 = vld [vmem:[%s974_s1 + $0x138] sm:$0xff]  ;;  %v78_v49 = vld [vmem:[%s974_s1 + $0x1c0] sm:$0xff]  ;;  %v79_v50 = vld [vmem:[%s974_s1 + $0x1c8] sm:$0xff]  ;;  %v544_v52 = vpack.c.bf16 %v47_v47, %v46_v46 }
   0xd   :  { %539 = vmatpush3.bf16.msra.mxu0 %v538_v33  ;;  %v574_v51 = vpack.c.bf16 %v61_v45, %v60_v44  ;;  %v30_v53 = vld [vmem:[%s974_s1 + $0x40] sm:$0xff]  ;;  %v31_v54 = vld [vmem:[%s974_s1 + $0x48] sm:$0xff]  ;;  %v576_v56 = vpack.c.bf16 %v79_v50, %v78_v49  ;;  %v48_v58 = vld [vmem:[%s974_s1 + $0xd0] sm:$0xff]  ;;  %v630_v50 = vmov 0.0|0.0  }
   0xe   :  { %541 = vmatprep.subr.bf16.mxu0 %v540_v39  ;;  %v62_v55 = vld [vmem:[%s974_s1 + $0x140] sm:$0xff]  ;;  %v63_v57 = vld [vmem:[%s974_s1 + $0x148] sm:$0xff]  ;;  %v49_v59 = vld [vmem:[%s974_s1 + $0xd8] sm:$0xff]  ;;  %v546_v62 = vpack.c.bf16 %v31_v54, %v30_v53 }
   0xf   :  { %571 = vmatpush3.bf16.msra.mxu1 %v570_v38  ;;  %v80_v60 = vld [vmem:[%s974_s1 + $0x1d0] sm:$0xff]  ;;  %v81_v61 = vld [vmem:[%s974_s1 + $0x1d8] sm:$0xff]  ;;  %v578_v63 = vpack.c.bf16 %v63_v57, %v62_v55  ;;  %v548_v0 = vpack.c.bf16 %v49_v59, %v48_v58  ;;  %v50_v6 = vld [vmem:[%s974_s1 + $0xe0] sm:$0xff] }
  0x10   :  { %573 = vmatprep.subr.bf16.mxu1 %v572_v43  ;;  %v32_v1 = vld [vmem:[%s974_s1 + $0x50] sm:$0xff]  ;;  %v33_v2 = vld [vmem:[%s974_s1 + $0x58] sm:$0xff]  ;;  %v580_v4 = vpack.c.bf16 %v81_v61, %v80_v60  ;;  %v51_v7 = vld [vmem:[%s974_s1 + $0xe8] sm:$0xff]  ;;  %v632_v60 = vmov 0.0  }
  0x11   :  { %543 = vmatpush3.bf16.msra.mxu0 %v542_v48  ;;  %v64_v3 = vld [vmem:[%s974_s1 + $0x150] sm:$0xff]  ;;  %v65_v5 = vld [vmem:[%s974_s1 + $0x158] sm:$0xff]  ;;  %v82_v8 = vld [vmem:[%s974_s1 + $0x1e0] sm:$0xff]  ;;  %v550_v10 = vpack.c.bf16 %v33_v2, %v32_v1  ;;  %v552_v14 = vpack.c.bf16 %v51_v7, %v50_v6 }
  0x12   :  { %545 = vmatprep.subr.bf16.mxu0 %v544_v52  ;;  %v83_v9 = vld [vmem:[%s974_s1 + $0x1e8] sm:$0xff]  ;;  %v34_v11 = vld [vmem:[%s974_s1 + $0x60] sm:$0xff]  ;;  %v582_v13 = vpack.c.bf16 %v65_v5, %v64_v3  ;;  %v52_v19 = vld [vmem:[%s974_s1 + $0xf0] sm:$0xff] }
  0x13   :  { %575 = vmatpush3.bf16.msra.mxu1 %v574_v51  ;;  %v16_v12 = vld [vmem:[%s975_s0 + $0x8] sm:$0xff]  ;;  %v66_v16 = vld [vmem:[%s974_s1 + $0x160] sm:$0xff]  ;;  %v584_v18 = vpack.c.bf16 %v83_v9, %v82_v8  ;;  %v53_v20 = vld [vmem:[%s974_s1 + $0xf8] sm:$0xff] }
  0x14   :  { %577 = vmatprep.subr.bf16.mxu1 %v576_v56  ;;  %v35_v15 = vld [vmem:[%s974_s1 + $0x68] sm:$0xff]  ;;  %190 = vmatprep.mubr.f32.mxu0 %v16_v12  ;;  %v18_v21 = vld [vmem:[%s975_s0 + $0x18] sm:$0xff]  ;;  %v84_v22 = vld [vmem:[%s974_s1 + $0x1f0] sm:$0xff]  ;;  %v556_v26 = vpack.c.bf16 %v53_v20, %v52_v19 }
  0x15   :  { %547 = vmatpush3.bf16.msra.mxu0 %v546_v62  ;;  %v67_v17 = vld [vmem:[%s974_s1 + $0x168] sm:$0xff]  ;;  %v85_v23 = vld [vmem:[%s974_s1 + $0x1f8] sm:$0xff]  ;;  %260 = vmatprep.mubr.f32.mxu1 %v18_v21  ;;  %v554_v24 = vpack.c.bf16 %v35_v15, %v34_v11  ;;  %v36_v27 = vld [vmem:[%s974_s1 + $0x70] sm:$0xff] }
  0x16   :  { %549 = vmatprep.subr.bf16.mxu0 %v548_v0  ;;  %v586_v25 = vpack.c.bf16 %v67_v17, %v66_v16  ;;  %v37_v28 = vld [vmem:[%s974_s1 + $0x78] sm:$0xff]  ;;  %v68_v29 = vld [vmem:[%s974_s1 + $0x170] sm:$0xff]  ;;  %v588_v30 = vpack.c.bf16 %v85_v23, %v84_v22  ;;  %v102_v32 = vld [vmem:[%s974_s1 + $0x280] sm:$0xff] }
  0x17   :  { %579 = vmatpush3.bf16.msra.mxu1 %v578_v63  ;;  %v69_v31 = vld [vmem:[%s974_s1 + $0x178] sm:$0xff]  ;;  %v103_v33 = vld [vmem:[%s974_s1 + $0x288] sm:$0xff]  ;;  %v558_v34 = vpack.c.bf16 %v37_v28, %v36_v27  ;;  %v86_v37 = vld [vmem:[%s974_s1 + $0x200] sm:$0xff] }
  0x18   :  { %581 = vmatprep.subr.bf16.mxu1 %v580_v4  ;;  %v590_v35 = vpack.c.bf16 %v69_v31, %v68_v29  ;;  %v592_v36 = vpack.c.bf16 %v103_v33, %v102_v32  ;;  %v87_v38 = vld [vmem:[%s974_s1 + $0x208] sm:$0xff]  ;;  %v104_v39 = vld [vmem:[%s974_s1 + $0x290] sm:$0xff]  ;;  %v105_v40 = vld [vmem:[%s974_s1 + $0x298] sm:$0xff]  ;;  %v121_v29 = vstv %s976_s2 }
  0x19   :  { %551 = vmatpush3.bf16.msra.mxu0 %v550_v10  ;;  %v15_v41 = vld [vmem:[%s975_s0] sm:$0xff]  ;;  %v594_v42 = vpack.c.bf16 %v87_v38, %v86_v37  ;;  %v17_v43 = vld [vmem:[%s975_s0 + $0x10] sm:$0xff]  ;;  %v596_v45 = vpack.c.bf16 %v105_v40, %v104_v39  ;;  %v89_v46 = vld [vmem:[%s974_s1 + $0x218] sm:$0xff] }
  0x1a   :  { %553 = vmatprep.subr.bf16.mxu0 %v552_v14  ;;  %v88_v44 = vld [vmem:[%s974_s1 + $0x210] sm:$0xff]  ;;  %v106_v47 = vld [vmem:[%s974_s1 + $0x2a0] sm:$0xff]  ;;  %v107_v48 = vld [vmem:[%s974_s1 + $0x2a8] sm:$0xff] }
  0x1b   :  { %583 = vmatpush3.bf16.msra.mxu1 %v582_v13  ;;  %v20_v49 = vld [vmem:[%s975_s0 + $0x28] sm:$0xff]  ;;  %v118_v51 = vld [vmem:[%s974_s1 + $0x300] sm:$0xff]  ;;  %v598_v54 = vpack.c.bf16 %v89_v46, %v88_v44  ;;  %v600_v55 = vpack.c.bf16 %v107_v48, %v106_v47  ;;  %v108_v58 = vld [vmem:[%s974_s1 + $0x2b0] sm:$0xff] }
  0x1c   :  { %585 = vmatprep.subr.bf16.mxu1 %v584_v18  ;;  %v119_v52 = vld [vmem:[%s974_s1 + $0x308] sm:$0xff]  ;;  %v90_v56 = vld [vmem:[%s974_s1 + $0x220] sm:$0xff]  ;;  %v109_v59 = vld [vmem:[%s974_s1 + $0x2b8] sm:$0xff] }
  0x1d   :  { %555 = vmatpush3.bf16.msra.mxu0 %v554_v24  ;;  %v625_v53 = vpack.c.bf16 %v119_v52, %v118_v51  ;;  %v91_v57 = vld [vmem:[%s974_s1 + $0x228] sm:$0xff]  ;;  %v21_v61 = vld [vmem:[%s975_s0 + $0x30] sm:$0xff]  ;;  %v604_v63 = vpack.c.bf16 %v109_v59, %v108_v58  ;;  %v93_v1 = vld [vmem:[%s974_s1 + $0x238] sm:$0xff] }
  0x1e   :  { %557 = vmatprep.subr.bf16.mxu0 %v556_v26  ;;  %v602_v62 = vpack.c.bf16 %v91_v57, %v90_v56  ;;  %v92_v0 = vld [vmem:[%s974_s1 + $0x230] sm:$0xff]  ;;  %v110_v2 = vld [vmem:[%s974_s1 + $0x2c0] sm:$0xff]  ;;  %v111_v3 = vld [vmem:[%s974_s1 + $0x2c8] sm:$0xff] }
  0x1f   :  { %587 = vmatpush3.bf16.msra.mxu1 %v586_v25  ;;  %v606_v4 = vpack.c.bf16 %v93_v1, %v92_v0  ;;  %v608_v5 = vpack.c.bf16 %v111_v3, %v110_v2  ;;  %v94_v6 = vld [vmem:[%s974_s1 + $0x240] sm:$0xff]  ;;  %v95_v7 = vld [vmem:[%s974_s1 + $0x248] sm:$0xff]  ;;  %v112_v8 = vld [vmem:[%s974_s1 + $0x2d0] sm:$0xff] }
  0x20   :  { %589 = vmatprep.subr.bf16.mxu1 %v588_v30  ;;  %v113_v9 = vld [vmem:[%s974_s1 + $0x2d8] sm:$0xff]  ;;  %v610_v10 = vpack.c.bf16 %v95_v7, %v94_v6  ;;  %v96_v12 = vld [vmem:[%s974_s1 + $0x250] sm:$0xff]  ;;  %v114_v14 = vld [vmem:[%s974_s1 + $0x2e0] sm:$0xff] }
  0x21   :  { %559 = vmatpush3.bf16.msra.mxu0 %v558_v34  ;;  %v612_v11 = vpack.c.bf16 %v113_v9, %v112_v8  ;;  %v97_v13 = vld [vmem:[%s974_s1 + $0x258] sm:$0xff]  ;;  %v115_v15 = vld [vmem:[%s974_s1 + $0x2e8] sm:$0xff]  ;;  %v98_v18 = vld [vmem:[%s974_s1 + $0x260] sm:$0xff] }
  0x22   :  { %593 = vmatprep.subr.bf16.mxu0 %v592_v36  ;;  %v614_v16 = vpack.c.bf16 %v97_v13, %v96_v12  ;;  %v616_v17 = vpack.c.bf16 %v115_v15, %v114_v14  ;;  %v99_v19 = vld [vmem:[%s974_s1 + $0x268] sm:$0xff]  ;;  %v116_v20 = vld [vmem:[%s974_s1 + $0x2f0] sm:$0xff]  ;;  %v117_v21 = vld [vmem:[%s974_s1 + $0x2f8] sm:$0xff] }
  0x23   :  { %591 = vmatpush3.bf16.msra.mxu1 %v590_v35  ;;  %v618_v22 = vpack.c.bf16 %v99_v19, %v98_v18  ;;  %v620_v23 = vpack.c.bf16 %v117_v21, %v116_v20  ;;  %v100_v24 = vld [vmem:[%s974_s1 + $0x270] sm:$0xff]  ;;  %v101_v25 = vld [vmem:[%s974_s1 + $0x278] sm:$0xff]  ;;  %v19_v27 = vld [vmem:[%s975_s0 + $0x20] sm:$0xff] }
  0x24   :  { %624 = vmatprep.subr.bf16.mxu1 %v630_v50  ;;  %191 = vmatmul.mubr.f32.vlgmr.msra.gmra.mrb[0].mxu0 %v15_v41  ;;  %v622_v26 = vpack.c.bf16 %v101_v25, %v100_v24 }
  0x25   :  { %595 = vmatpush3.bf16.msra.mxu0 %v594_v42  ;;  %330 = vmatprep.mubr.f32.mxu0 %v20_v49 }
  0x26   :  { %261 = vmatmul.mubr.f32.vlgmr.msra.gmra.mrb[0].mxu1 %v17_v43  ;;  %597 = vmatprep.subr.bf16.mxu0 %v596_v45 }
  0x27   :  { %626 = vmatpush3.bf16.msra.mxu1 %v625_v53  ;;  %525 = vmatprep.mubr.msk.f32.mxu1 %vm631_vm0, %v632_v60 }
  0x29   :  { %599 = vmatpush3.bf16.msra.mxu0 %v598_v54 }
  0x2a   :  { %601 = vmatprep.subr.bf16.mxu0 %v600_v55  ;;  %526 = vmatmul.mubr.msk.f32.vlgmr.msra.gmra.mrb[2].mxu1 %vm122_vm1, %v21_v61 }
  0x2d   :  { %603 = vmatpush3.bf16.msra.mxu0 %v602_v62 }
  0x2e   :  { %605 = vmatprep.subr.bf16.mxu0 %v604_v63 }
  0x31   :  { %607 = vmatpush3.bf16.msra.mxu0 %v606_v4 }
  0x32   :  { %609 = vmatprep.subr.bf16.mxu0 %v608_v5 }
  0x35   :  { %611 = vmatpush3.bf16.msra.mxu0 %v610_v10 }
  0x36   :  { %613 = vmatprep.subr.bf16.mxu0 %v612_v11 }
  0x39   :  { %615 = vmatpush3.bf16.msra.mxu0 %v614_v16 }
  0x3a   :  { %617 = vmatprep.subr.bf16.mxu0 %v616_v17 }
  0x3d   :  { %619 = vmatpush3.bf16.msra.mxu0 %v618_v22 }
  0x3e   :  { %621 = vmatprep.subr.bf16.mxu0 %v620_v23 }
  0x41   :  { %623 = vmatpush3.bf16.msra.mxu0 %v622_v26 }
  0x44   :  { %331 = vmatmul.mubr.f32.vlgmr.msra.gmra.mrb[2].mxu0 %v19_v27 }
  0xf7   :  { %v445_v28 = vpop.f32.mrb[0].mxu0 }
  0xf8   :  { %v446_v30 = vpop.f32.mrb[1].mxu0 }
  0xf9   :  { %v480_v31 = vpop.f32.mrb[0].mxu1  ;;  %v447_v32 = vadd.f32 %v446_v30, %v445_v28 }
  0xfa   :  { %v481_v33 = vpop.f32.mrb[1].mxu1 }
  0xfb   :  { %v482_v34 = vadd.f32 %v481_v33, %v480_v31  ;;  %v193_v35 = vadd.f32 %v447_v32, %v121_v29 }
  0xfd   :  { %v263_v36 = vadd.f32 %v482_v34, %v193_v35  ;;  %v402_v37 = vpop.f32.mrb[2].mxu1 }
  0xfe   :  { %v527_v38 = vpop.f32.mrb[3].mxu1 }
 0x117   :  { %v515_v39 = vpop.f32.mrb[2].mxu0 }
 0x118   :  { %v516_v40 = vpop.f32.mrb[3].mxu0 }
 0x119   :  { %v517_v41 = vadd.f32 %v516_v40, %v515_v39 }
 0x11b   :  { %v333_v42 = vadd.f32 %v517_v41, %v263_v36 }
 0x11d   :  { %v403_v43 = vadd.f32 %v402_v37, %v333_v42 }
 0x11f   :  { %407 = vst.msk [vmem:[%s977_s3] sm:$0xff] %vm406_vm2, %v403_v43 }

</bundles_post_ra>
